<compile_context>
chip_gen: v7x
topology: tpu7x:2x2x1
jax: 0.10.0
libtpu: 0.0.40
codegen_flags: <defaults>
</compile_context>

<pallas_src>
from functools import partial

import jax
import jax.numpy as jnp
from jax.experimental import pallas as pl
from jax.experimental.pallas import tpu as pltpu


def _modified_dnn_kernel(xT_ref,
                         w3T_ref, b3T_ref,          # fused input/U/V projection (f32)
                         whT_ref, bhT_ref,          # stacked hidden layers
                         woutT_ref, boutT_ref,      # output layer
                         oT_ref,
                         *, num_hidden, hidden_dim, matmul_dtype, tanh_dtype):
    """One batch tile of Modified_DNN, everything in [features, batch] layout."""
    xT = xT_ref[...]                                  # [input_dim, tile_n], f32

    # Fused H/U/V projection in f32: one [3H, in] @ [in, tile_n] MXU push
    # (K = input_dim is tiny, so f32 here is free), one tanh.
    huv = jnp.tanh(
        jnp.dot(w3T_ref[...], xT, preferred_element_type=jnp.float32)
        + b3T_ref[...])                               # [3H, tile_n], f32

    H = huv[0 * hidden_dim:1 * hidden_dim, :].astype(matmul_dtype)
    U = huv[1 * hidden_dim:2 * hidden_dim, :]         # f32, persists all layers
    V = huv[2 * hidden_dim:3 * hidden_dim, :]
    D = V - U                                         # loop-invariant, hoisted

    # Hidden layers: Z = tanh(W_h^T H + b_h);  H = U + Z*D  (== (1-Z)U + ZV).
    # Z tanh runs in tanh_dtype (bf16 on v6e/v7x); gating math stays f32 and H
    # is produced directly in matmul_dtype for the next MXU push.
    for i in range(num_hidden):                       # static unroll, small count
        pre = (jnp.dot(whT_ref[i], H, preferred_element_type=jnp.float32)
               + bhT_ref[i])
        Z = jnp.tanh(pre.astype(tanh_dtype))
        H = (U + Z * D).astype(matmul_dtype)

    # Output layer: tanh(W_out^T H + b_out) -> lane-dense [output_dim, tile_n].
    out = jnp.tanh(
        jnp.dot(woutT_ref[...], H, preferred_element_type=jnp.float32)
        + boutT_ref[...])
    oT_ref[...] = out.astype(oT_ref.dtype)


def init_reconstruct_point_params(key, layer_size, dtype=jnp.float32):
    """Deterministic synthetic parameters (shapes follow Modified_DNN.__init__).

    Weights are stored as [in_dim, out_dim] (PyTorch W transposed), biases as
    [1, out_dim].  Hidden layers are stacked: w_h [L, H, H], b_h [L, 1, H].
    """
    input_dim = layer_size[0]
    hidden_dim = layer_size[1]
    output_dim = layer_size[-1]
    num_hidden = len(layer_size) - 2

    keys = jax.random.split(key, 5 + num_hidden)

    def linear(k, fan_in, fan_out):
        bound = 1.0 / jnp.sqrt(jnp.float32(fan_in))
        kw, kb = jax.random.split(k)
        w = jax.random.uniform(kw, (fan_in, fan_out), dtype, -bound, bound)
        b = jax.random.uniform(kb, (1, fan_out), dtype, -bound, bound)
        return w, b

    w_in, b_in = linear(keys[0], input_dim, hidden_dim)
    w_u, b_u = linear(keys[1], input_dim, hidden_dim)
    w_v, b_v = linear(keys[2], input_dim, hidden_dim)

    w_h_list, b_h_list = [], []
    for i in range(num_hidden):
        w, b = linear(keys[3 + i], hidden_dim, hidden_dim)
        w_h_list.append(w)
        b_h_list.append(b[None])              # [1, 1, H]
    w_h = jnp.stack(w_h_list, axis=0)         # [L, H, H]
    b_h = jnp.concatenate(b_h_list, axis=0)   # [L, 1, H]

    w_out, b_out = linear(keys[3 + num_hidden], hidden_dim, output_dim)

    return dict(w_in=w_in, b_in=b_in, w_u=w_u, b_u=b_u, w_v=w_v, b_v=b_v,
                w_h=w_h, b_h=b_h, w_out=w_out, b_out=b_out,
                num_hidden=num_hidden)


def _pick_tile_n(N, matmul_dtype):
    """Vreg-resident tile on the lane axis; >=2 grid steps when N allows (v7x)."""
    # f32 loop state (H,U,D,Z ~ 4*H*tile_n*4B) fits the 256 KiB vreg file at
    # tile_n ~ 256; bf16-resident H allows ~512.  Sweep {256,512,1024,2048} per
    # chip for production shapes.
    cap = 512 if matmul_dtype == jnp.bfloat16 else 256
    for c in (cap, cap // 2, 128):
        if N % c == 0 and N // c >= 2:
            return c
    # Small batch: single grid step covering everything.
    return N


def reconstruct_point_forward_T(xT, params, *, tile_n=None,
                                matmul_dtype=jnp.bfloat16, bf16_tanh=None):
    """Core Pallas entry: xT [input_dim, N] -> out^T [output_dim, N].

    Using the transposed interfaces avoids two extra HBM read+write passes for
    callers that already hold data in [features, batch] orientation.
    """
    input_dim, N = xT.shape
    num_hidden = params["num_hidden"]
    hidden_dim = params["w_in"].shape[1]
    output_dim = params["w_out"].shape[1]

    assert hidden_dim % 8 == 0, (
        "hidden_dim must be a multiple of 8 so the fused H/U/V row-slices stay "
        "on (8,128) tile boundaries (else 3x activation copies per step)")

    if bf16_tanh is None:
        # bf16 tanh helps on v6e/v7x (bf16 EUP); pass bf16_tanh=False on v5e.
        bf16_tanh = (matmul_dtype == jnp.bfloat16)
    tanh_dtype = jnp.bfloat16 if bf16_tanh else jnp.float32

    if tile_n is None:
        tile_n = _pick_tile_n(N, matmul_dtype)
    assert N % tile_n == 0, "batch must be divisible by tile_n"
    assert tile_n % 128 == 0 or tile_n == N, \
        "lane-axis tile should be a multiple of 128 (or the full batch)"

    # ---- host-side parameter re-layout (tiny arrays) ------------------------
    # Fused input projection stays f32: [3H, input_dim], bias [3H, 1].
    w3T = jnp.concatenate([params["w_in"], params["w_u"], params["w_v"]],
                          axis=1).T.astype(jnp.float32)
    b3T = jnp.concatenate([params["b_in"], params["b_u"], params["b_v"]],
                          axis=1).T.astype(jnp.float32)
    # Hidden layers: [L, H(out), H(in)] in matmul_dtype, bias [L, H, 1] f32.
    whT = jnp.transpose(params["w_h"], (0, 2, 1)).astype(matmul_dtype)
    bhT = jnp.transpose(params["b_h"], (0, 2, 1)).astype(jnp.float32)
    # Output layer: [output_dim, H] in matmul_dtype, bias [output_dim, 1] f32.
    woutT = params["w_out"].T.astype(matmul_dtype)
    boutT = params["b_out"].T.astype(jnp.float32)

    xT = xT.astype(jnp.float32)

    grid = (N // tile_n,)
    rep2 = lambda i: (0, 0)      # whole 2-D parameter resident every step
    rep3 = lambda i: (0, 0, 0)   # whole 3-D stacked parameter resident every step

    kernel = partial(_modified_dnn_kernel, num_hidden=num_hidden,
                     hidden_dim=hidden_dim, matmul_dtype=matmul_dtype,
                     tanh_dtype=tanh_dtype)

    itemsize = lambda a: a.size * a.dtype.itemsize
    cost = pl.CostEstimate(
        flops=2 * (3 * hidden_dim * input_dim
                   + num_hidden * hidden_dim * hidden_dim
                   + hidden_dim * output_dim) * N,
        transcendentals=(3 * hidden_dim + num_hidden * hidden_dim
                         + output_dim) * N,
        bytes_accessed=(itemsize(xT) + output_dim * N * xT.dtype.itemsize
                        + sum(itemsize(a)
                              for a in (w3T, b3T, whT, bhT, woutT, boutT))),
    )

    outT = pl.pallas_call(
        kernel,
        out_shape=jax.ShapeDtypeStruct((output_dim, N), xT.dtype),
        grid=grid,
        in_specs=[
            pl.BlockSpec((input_dim, tile_n), lambda i: (0, i)),   # x^T tile
            pl.BlockSpec(w3T.shape, rep2),
            pl.BlockSpec(b3T.shape, rep2),
            pl.BlockSpec(whT.shape, rep3),
            pl.BlockSpec(bhT.shape, rep3),
            pl.BlockSpec(woutT.shape, rep2),
            pl.BlockSpec(boutT.shape, rep2),
        ],
        out_specs=pl.BlockSpec((output_dim, tile_n), lambda i: (0, i)),
        compiler_params=pltpu.CompilerParams(
            dimension_semantics=("parallel",)),
        cost_estimate=cost,
    )(xT, w3T, b3T, whT, bhT, woutT, boutT)

    return outT                                       # [output_dim, N]


def reconstruct_point_forward(x, params, *, tile_n=None,
                              matmul_dtype=jnp.bfloat16, bf16_tanh=None):
    """Convenience wrapper: x [N, input_dim] -> [N, output_dim].

    NOTE: the two transposes below each cost a full extra HBM read+write of the
    activations; performance-critical callers should use
    reconstruct_point_forward_T and keep data in [features, batch] layout.
    """
    outT = reconstruct_point_forward_T(x.T, params, tile_n=tile_n,
                                       matmul_dtype=matmul_dtype,
                                       bf16_tanh=bf16_tanh)
    return outT.T


def reconstruct_point_ref(x, params):
    """Pure-JAX reference (mirrors the PyTorch forward exactly, f32)."""
    dt = lambda a, w, b: jnp.tanh(a @ w + b)
    H = dt(x, params["w_in"], params["b_in"])
    U = dt(x, params["w_u"], params["b_u"])
    V = dt(x, params["w_v"], params["b_v"])
    for i in range(params["num_hidden"]):
        Z = dt(H, params["w_h"][i], params["b_h"][i])
        H = (1.0 - Z) * U + Z * V
    return dt(H, params["w_out"], params["b_out"])


if __name__ == "__main__":
    # layer_size = [input_dim, hidden, hidden, hidden, output_dim]
    layer_size = [4, 32, 32, 32, 2]     # -> num_hidden = 3
    N = 512                             # small batch; grid gets >= 2 steps

    key = jax.random.PRNGKey(0)
    k_x, k_p = jax.random.split(key)
    x = jax.random.normal(k_x, (N, layer_size[0]), jnp.float32)
    params = init_reconstruct_point_params(k_p, layer_size)

    ref = reconstruct_point_ref(x, params)

    # f32 matmul + f32 tanh path: strict check against the reference.
    out_f32 = jax.block_until_ready(
        reconstruct_point_forward(x, params, matmul_dtype=jnp.float32))
    assert out_f32.shape == (N, layer_size[-1])
    assert jnp.allclose(out_f32, ref, atol=1e-5, rtol=1e-5), "f32 mismatch"

    # Default path: bf16 hidden/output matmuls + bf16 Z-tanh (input projection
    # stays f32).  Loose tolerance.
    out_bf16 = jax.block_until_ready(reconstruct_point_forward(x, params))
    assert out_bf16.shape == (N, layer_size[-1])
    assert jnp.allclose(out_bf16, ref, atol=3e-2, rtol=0.0), "bf16 mismatch"

    print("KERNEL_OK")
</pallas_src>

<mosaic_0001>
module attributes {stable_mosaic.version = 11 : i64} {
  func.func @_modified_dnn_kernel(%arg0: i32, %arg1: memref<4x256xf32, #tpu.memory_space<vmem>>, %arg2: memref<96x4xf32, #tpu.memory_space<vmem>>, %arg3: memref<96x1xf32, #tpu.memory_space<vmem>>, %arg4: memref<3x32x32xf32, #tpu.memory_space<vmem>>, %arg5: memref<3x32x1xf32, #tpu.memory_space<vmem>>, %arg6: memref<2x32xf32, #tpu.memory_space<vmem>>, %arg7: memref<2x1xf32, #tpu.memory_space<vmem>>, %arg8: memref<2x256xf32, #tpu.memory_space<vmem>>) attributes {dimension_semantics = [#tpu.dimension_semantics<parallel>], iteration_bounds = array<i64: 2>, scalar_prefetch = 0 : i64, scratch_operands = 0 : i64, tpu.core_type = #tpu.core_type<tc>, window_params = [{transform_indices = @transform_0, window_bounds = array<i64: 4, 256>}, {pipeline_mode = #tpu.pipeline_mode<synchronous>, transform_indices = @transform_1, window_bounds = array<i64: 96, 4>}, {pipeline_mode = #tpu.pipeline_mode<synchronous>, transform_indices = @transform_2, window_bounds = array<i64: 96, 1>}, {pipeline_mode = #tpu.pipeline_mode<synchronous>, transform_indices = @transform_3, window_bounds = array<i64: 3, 32, 32>}, {pipeline_mode = #tpu.pipeline_mode<synchronous>, transform_indices = @transform_4, window_bounds = array<i64: 3, 32, 1>}, {pipeline_mode = #tpu.pipeline_mode<synchronous>, transform_indices = @transform_5, window_bounds = array<i64: 2, 32>}, {pipeline_mode = #tpu.pipeline_mode<synchronous>, transform_indices = @transform_6, window_bounds = array<i64: 2, 1>}, {transform_indices = @transform_7, window_bounds = array<i64: 2, 256>}]} {
    %c0 = arith.constant 0 : index
    %c0_0 = arith.constant 0 : index
    %0 = vector.load %arg1[%c0, %c0_0] : memref<4x256xf32, #tpu.memory_space<vmem>>, vector<4x256xf32>
    %c0_1 = arith.constant 0 : index
    %c0_2 = arith.constant 0 : index
    %1 = vector.load %arg2[%c0_1, %c0_2] : memref<96x4xf32, #tpu.memory_space<vmem>>, vector<96x4xf32>
    %cst = arith.constant dense<0.000000e+00> : vector<96x256xf32>
    %2 = tpu.matmul %1, %0, %cst {dimension_numbers = #tpu.dot_dimension_numbers<[1], [0], [0], [1], [0, 0, 1, 1], [], []>} : vector<96x4xf32>, vector<4x256xf32>, vector<96x256xf32> -> vector<96x256xf32>
    %c0_3 = arith.constant 0 : index
    %c0_4 = arith.constant 0 : index
    %3 = vector.load %arg3[%c0_3, %c0_4] : memref<96x1xf32, #tpu.memory_space<vmem>>, vector<96x1xf32>
    %4 = vector.broadcast %3 : vector<96x1xf32> to vector<96x256xf32>
    %5 = arith.addf %2, %4 : vector<96x256xf32>
    %6 = math.tanh %5 : vector<96x256xf32>
    %7 = vector.extract_strided_slice %6 {offsets = [0, 0], sizes = [32, 256], strides = [1, 1]} : vector<96x256xf32> to vector<32x256xf32>
    %8 = vector.extract_strided_slice %6 {offsets = [32, 0], sizes = [32, 256], strides = [1, 1]} : vector<96x256xf32> to vector<32x256xf32>
    %9 = vector.extract_strided_slice %6 {offsets = [64, 0], sizes = [32, 256], strides = [1, 1]} : vector<96x256xf32> to vector<32x256xf32>
    %10 = arith.subf %9, %8 : vector<32x256xf32>
    %c0_5 = arith.constant 0 : index
    %c0_6 = arith.constant 0 : index
    %c0_7 = arith.constant 0 : index
    %11 = vector.load %arg4[%c0_5, %c0_6, %c0_7] : memref<3x32x32xf32, #tpu.memory_space<vmem>>, vector<1x32x32xf32>
    %12 = vector.shape_cast %11 : vector<1x32x32xf32> to vector<32x32xf32>
    %cst_8 = arith.constant dense<0.000000e+00> : vector<32x256xf32>
    %13 = tpu.matmul %12, %7, %cst_8 {dimension_numbers = #tpu.dot_dimension_numbers<[1], [0], [0], [1], [0, 0, 1, 1], [], []>} : vector<32x32xf32>, vector<32x256xf32>, vector<32x256xf32> -> vector<32x256xf32>
    %c0_9 = arith.constant 0 : index
    %c0_10 = arith.constant 0 : index
    %c0_11 = arith.constant 0 : index
    %14 = vector.load %arg5[%c0_9, %c0_10, %c0_11] : memref<3x32x1xf32, #tpu.memory_space<vmem>>, vector<1x32x1xf32>
    %15 = vector.shape_cast %14 : vector<1x32x1xf32> to vector<32x1xf32>
    %16 = vector.broadcast %15 : vector<32x1xf32> to vector<32x256xf32>
    %17 = arith.addf %13, %16 : vector<32x256xf32>
    %18 = math.tanh %17 : vector<32x256xf32>
    %19 = arith.mulf %18, %10 : vector<32x256xf32>
    %20 = arith.addf %8, %19 : vector<32x256xf32>
    %c1 = arith.constant 1 : index
    %c0_12 = arith.constant 0 : index
    %c0_13 = arith.constant 0 : index
    %21 = vector.load %arg4[%c1, %c0_12, %c0_13] : memref<3x32x32xf32, #tpu.memory_space<vmem>>, vector<1x32x32xf32>
    %22 = vector.shape_cast %21 : vector<1x32x32xf32> to vector<32x32xf32>
    %cst_14 = arith.constant dense<0.000000e+00> : vector<32x256xf32>
    %23 = tpu.matmul %22, %20, %cst_14 {dimension_numbers = #tpu.dot_dimension_numbers<[1], [0], [0], [1], [0, 0, 1, 1], [], []>} : vector<32x32xf32>, vector<32x256xf32>, vector<32x256xf32> -> vector<32x256xf32>
    %c1_15 = arith.constant 1 : index
    %c0_16 = arith.constant 0 : index
    %c0_17 = arith.constant 0 : index
    %24 = vector.load %arg5[%c1_15, %c0_16, %c0_17] : memref<3x32x1xf32, #tpu.memory_space<vmem>>, vector<1x32x1xf32>
    %25 = vector.shape_cast %24 : vector<1x32x1xf32> to vector<32x1xf32>
    %26 = vector.broadcast %25 : vector<32x1xf32> to vector<32x256xf32>
    %27 = arith.addf %23, %26 : vector<32x256xf32>
    %28 = math.tanh %27 : vector<32x256xf32>
    %29 = arith.mulf %28, %10 : vector<32x256xf32>
    %30 = arith.addf %8, %29 : vector<32x256xf32>
    %c2 = arith.constant 2 : index
    %c0_18 = arith.constant 0 : index
    %c0_19 = arith.constant 0 : index
    %31 = vector.load %arg4[%c2, %c0_18, %c0_19] : memref<3x32x32xf32, #tpu.memory_space<vmem>>, vector<1x32x32xf32>
    %32 = vector.shape_cast %31 : vector<1x32x32xf32> to vector<32x32xf32>
    %cst_20 = arith.constant dense<0.000000e+00> : vector<32x256xf32>
    %33 = tpu.matmul %32, %30, %cst_20 {dimension_numbers = #tpu.dot_dimension_numbers<[1], [0], [0], [1], [0, 0, 1, 1], [], []>} : vector<32x32xf32>, vector<32x256xf32>, vector<32x256xf32> -> vector<32x256xf32>
    %c2_21 = arith.constant 2 : index
    %c0_22 = arith.constant 0 : index
    %c0_23 = arith.constant 0 : index
    %34 = vector.load %arg5[%c2_21, %c0_22, %c0_23] : memref<3x32x1xf32, #tpu.memory_space<vmem>>, vector<1x32x1xf32>
    %35 = vector.shape_cast %34 : vector<1x32x1xf32> to vector<32x1xf32>
    %36 = vector.broadcast %35 : vector<32x1xf32> to vector<32x256xf32>
    %37 = arith.addf %33, %36 : vector<32x256xf32>
    %38 = math.tanh %37 : vector<32x256xf32>
    %39 = arith.mulf %38, %10 : vector<32x256xf32>
    %40 = arith.addf %8, %39 : vector<32x256xf32>
    %c0_24 = arith.constant 0 : index
    %c0_25 = arith.constant 0 : index
    %41 = vector.load %arg6[%c0_24, %c0_25] : memref<2x32xf32, #tpu.memory_space<vmem>>, vector<2x32xf32>
    %cst_26 = arith.constant dense<0.000000e+00> : vector<2x256xf32>
    %42 = tpu.matmul %41, %40, %cst_26 {dimension_numbers = #tpu.dot_dimension_numbers<[1], [0], [0], [1], [0, 0, 1, 1], [], []>} : vector<2x32xf32>, vector<32x256xf32>, vector<2x256xf32> -> vector<2x256xf32>
    %c0_27 = arith.constant 0 : index
    %c0_28 = arith.constant 0 : index
    %43 = vector.load %arg7[%c0_27, %c0_28] : memref<2x1xf32, #tpu.memory_space<vmem>>, vector<2x1xf32>
    %44 = vector.broadcast %43 : vector<2x1xf32> to vector<2x256xf32>
    %45 = arith.addf %42, %44 : vector<2x256xf32>
    %46 = math.tanh %45 : vector<2x256xf32>
    %c0_29 = arith.constant 0 : index
    %c0_30 = arith.constant 0 : index
    %47 = vector.load %arg8[%c0_29, %c0_30] : memref<2x256xf32, #tpu.memory_space<vmem>>, vector<2x256xf32>
    tpu.vector_store %arg8[%c0_29, %c0_30], %46 {strides = array<i32>} : memref<2x256xf32, #tpu.memory_space<vmem>>, vector<2x256xf32>,
    return
  }
  func.func @transform_0(%arg0: i32) -> (i32, i32) {
    %c0_i32 = arith.constant 0 : i32
    %c0_i32_0 = arith.constant 0 : i32
    return %c0_i32, %arg0 : i32, i32
  }
  func.func @transform_1(%arg0: i32) -> (i32, i32) {
    %c0_i32 = arith.constant 0 : i32
    %c0_i32_0 = arith.constant 0 : i32
    %c0_i32_1 = arith.constant 0 : i32
    return %c0_i32, %c0_i32_0 : i32, i32
  }
  func.func @transform_2(%arg0: i32) -> (i32, i32) {
    %c0_i32 = arith.constant 0 : i32
    %c0_i32_0 = arith.constant 0 : i32
    %c0_i32_1 = arith.constant 0 : i32
    return %c0_i32, %c0_i32_0 : i32, i32
  }
  func.func @transform_3(%arg0: i32) -> (i32, i32, i32) {
    %c0_i32 = arith.constant 0 : i32
    %c0_i32_0 = arith.constant 0 : i32
    %c0_i32_1 = arith.constant 0 : i32
    %c0_i32_2 = arith.constant 0 : i32
    return %c0_i32, %c0_i32_0, %c0_i32_1 : i32, i32, i32
  }
  func.func @transform_4(%arg0: i32) -> (i32, i32, i32) {
    %c0_i32 = arith.constant 0 : i32
    %c0_i32_0 = arith.constant 0 : i32
    %c0_i32_1 = arith.constant 0 : i32
    %c0_i32_2 = arith.constant 0 : i32
    return %c0_i32, %c0_i32_0, %c0_i32_1 : i32, i32, i32
  }
  func.func @transform_5(%arg0: i32) -> (i32, i32) {
    %c0_i32 = arith.constant 0 : i32
    %c0_i32_0 = arith.constant 0 : i32
    %c0_i32_1 = arith.constant 0 : i32
    return %c0_i32, %c0_i32_0 : i32, i32
  }
  func.func @transform_6(%arg0: i32) -> (i32, i32) {
    %c0_i32 = arith.constant 0 : i32
    %c0_i32_0 = arith.constant 0 : i32
    %c0_i32_1 = arith.constant 0 : i32
    return %c0_i32, %c0_i32_0 : i32, i32
  }
  func.func @transform_7(%arg0: i32) -> (i32, i32) {
    %c0_i32 = arith.constant 0 : i32
    %c0_i32_0 = arith.constant 0 : i32
    return %c0_i32, %arg0 : i32, i32
  }
}

</mosaic_0001>

<bundles_post_ra>
// kernel: tpu_custom_call.1
= control target key start
LH: loop header
LB: loop body
LE: loop exit
PB: predicated region body
PF: predicated region fallthrough
CT: control target
= control target key end

     0   :  { %12 = vsyncpa [#allocation3], 0  ;;  %s1944_s0 = inlined_call_operand.vmem [shape: f32[4,512], index: 0, kind: input, shape index: {}]   ;;  %s1945_s1 = inlined_call_operand.vmem [shape: f32[96,4], index: 1, kind: input, shape index: {}]   ;;  %s1946_s2 = inlined_call_operand.vmem [shape: f32[96,1], index: 2, kind: input, shape index: {}]   ;;  %s1947_s3 = inlined_call_operand.vmem [shape: f32[3,32,32], index: 3, kind: input, shape index: {}]   ;;  %s1948_s4 = inlined_call_operand.vmem [shape: f32[3,32,1], index: 4, kind: input, shape index: {}]   ;;  %s1949_s5 = inlined_call_operand.vmem [shape: f32[2,32], index: 5, kind: input, shape index: {}]   ;;  %s1950_s6 = inlined_call_operand.vmem [shape: f32[2,1], index: 6, kind: input, shape index: {}]   ;;  %s1951_s7 = inlined_call_operand.hbm [shape: f32[2,512], index: 7, kind: output, shape index: {}]  }
   0x1   :  { %14 = vsyncpa [#allocation3 + $0x1], 0  ;;  %s1551_s24 = smov 0   ;;  %s1553_s25 = smov 0  }
   0x2   :  { %s1555_s26 = smov 0   ;;  %s1557_s27 = smov 0  }
   0x3 LB: > { %s1572_s28 = sadd.s32 4294967295, %s1506_s27   ;;  %s1211_s29 = sadd.s32 4294967294, %s1506_s27   ;;  %s1506_s27 = sphi %s1557_s27, %s1957_s27   ;;  %s1502_s26 = sphi %s1555_s26, %s1956_s26   ;;  %s1498_s25 = sphi %s1553_s25, %s1955_s25   ;;  %s1494_s24 = sphi %s1551_s24, %s1954_s24  }
   0x4   : > { %s1576_s30 = sadd.s32 1, %s1506_s27   ;;  %s179_s8 = sadd.s32 1, %s1502_s26 }
   0x5   : > { %s176_s9 = ssub.s32 %s1506_s27, %s1576_s30  ;;  %p189_p0 = scmp.ne.s32.totalorder %s1502_s26, %s1498_s25 }
   0x6   : > { %p177_p1 = scmp.eq.s32.totalorder %s176_s9, 0  ;;  %p190_p2 = scmp.eq.s32.totalorder %s1572_s28, 1 }
   0x7   : > { %p195_p3 = scmp.ne.s32.totalorder %s1498_s25, %s1494_s24  ;;  %p196_p4 = scmp.eq.s32.totalorder %s1211_s29, 1 }
   0x8   : > { %s1587_s10 = scalar_select %p177_p1, %s1502_s26, %s179_s8  }
   0x9   : > { %p1589_p5 = por %p190_p2, %p189_p0  ;;  %p1593_p6 = por %p196_p4, %p195_p3 }
   0xa   : > { %p1214_p7 = scmp.ge.s32.totalorder %s1506_s27, 1  ;;  %p241_p8 = scmp.lt.s32.totalorder %s1506_s27, 3 }
   0xc   : > { %p242_p9 = pnand %p1214_p7, %p241_p8 }
   0xd   : > { %s1216_s13 = sshll.u32 (!%p242_p9), %s1572_s28, 1  ;;  %v1508_v0 = vmov (!%p242_p9), 0.0   ;;  %v1509_v1 = vmov (!%p242_p9), 0   ;;  %v293_v2 = vld [vmem:[%s1946_s2] sm:$0xff] (!%p242_p9)  ;;  %v295_v3 = vld [vmem:[%s1946_s2 + $0x10] sm:$0xff] (!%p242_p9)  ;;  %v294_v4 = vld [vmem:[%s1946_s2 + $0x8] sm:$0xff] (!%p242_p9) }
   0xe   : > { %245 = sbr.rel (%p242_p9) target bundleno = 1259 (0x4eb), region = 48  ;;  %p274_p10 = scmp.lt.s32.totalorder (!%p242_p9), %s1216_s13, 3  ;;  %473 = vmatprep.mubr.f32.mxu0 (!%p242_p9), %v1508_v0  ;;  %683 = vmatprep.mubr.f32.mxu1 (!%p242_p9), %v1508_v0  ;;  %vm404_vm0 = vcmask (!%p242_p9), 1043456   ;;  %v296_v6 = vld [vmem:[%s1946_s2 + $0x18] sm:$0xff] (!%p242_p9)  ;;  %v281_v8 = vld [vmem:[%s1945_s1] sm:$0xff] (!%p242_p9)  ;;  %vm367_vm1 = vcmask (!%p242_p9), 31744  }
   0xf   : > { %1341 = vset.pattern.permute.xlu0 (!%p242_p9), %v1509_v1  ;;  %1342 = vset.pattern.permute.xlu1 (!%p242_p9), %v1509_v1  ;;  %v297_v9 = vld [vmem:[%s1946_s2 + $0x20] sm:$0xff] (!%p242_p9)  ;;  %v298_v10 = vld [vmem:[%s1946_s2 + $0x28] sm:$0xff] (!%p242_p9)  ;;  %v283_v14 = vld [vmem:[%s1945_s1 + $0x10] sm:$0xff] (!%p242_p9)  ;;  %vm606_vm2 = vcmask (!%p242_p9), 261120   ;;  %s270_s20 = sand.u32 (!%p242_p9), 1, %s1498_s25   ;;  %s1267_s22 = sshll.u32 (!%p242_p9), %s1572_s28, 6 }
  0x10   : > { %307 = vperm.xlu0 (!%p242_p9), %1341, %v293_v2   ;;  %317 = vperm.xlu1 (!%p242_p9), %1342, %v295_v3   ;;  %v282_v11 = vld [vmem:[%s1945_s1 + $0x8] sm:$0xff] (!%p242_p9)  ;;  %v301_v12 = vld [vmem:[%s1946_s2 + $0x40] sm:$0xff] (!%p242_p9)  ;;  %v284_v17 = vld [vmem:[%s1945_s1 + $0x18] sm:$0xff] (!%p242_p9)  ;;  %s1138_s14 = scalar_lea.sflag (!%p242_p9), [#allocation3], %s270_s20  ;;  %s1510_s28 = smov (!%p242_p9), [#allocation2]  }
  0x11   : > { %v302_v13 = vld [vmem:[%s1946_s2 + $0x48] sm:$0xff] (!%p242_p9)  ;;  %v582_v15 = vld [vmem:[%s1948_s4] sm:$0xff] (!%p242_p9)  ;;  %v299_v18 = vld [vmem:[%s1946_s2 + $0x30] sm:$0xff] (!%p242_p9) }
  0x12   : > { %v583_v16 = vld [vmem:[%s1948_s4 + $0x8] sm:$0xff] (!%p242_p9)  ;;  %v300_v19 = vld [vmem:[%s1946_s2 + $0x38] sm:$0xff] (!%p242_p9)  ;;  %v285_v20 = vld [vmem:[%s1945_s1 + $0x20] sm:$0xff] (!%p242_p9) }
  0x13   : > { %v303_v21 = vld [vmem:[%s1946_s2 + $0x50] sm:$0xff] (!%p242_p9)  ;;  %v304_v22 = vld [vmem:[%s1946_s2 + $0x58] sm:$0xff] (!%p242_p9)  ;;  %v286_v23 = vld [vmem:[%s1945_s1 + $0x28] sm:$0xff] (!%p242_p9) }
  0x14   : > { %312 = vperm.xlu0 (!%p242_p9), %1341, %v294_v4   ;;  %322 = vperm.xlu1 (!%p242_p9), %1342, %v296_v6   ;;  %v584_v24 = vld [vmem:[%s1948_s4 + $0x10] sm:$0xff] (!%p242_p9)  ;;  %v585_v25 = vld [vmem:[%s1948_s4 + $0x18] sm:$0xff] (!%p242_p9)  ;;  %v1240_v27 = vld [vmem:[%s1948_s4 + $0x20] sm:$0xff] (!%p242_p9) }
  0x15   : > { %s1959_s13 = smov (!%p274_p10, %s1216_s13), 3  ;;  %v287_v26 = vld [vmem:[%s1945_s1 + $0x30] sm:$0xff]  ;;  %v1241_v28 = vld [vmem:[%s1948_s4 + $0x28] sm:$0xff]  ;;  %v288_v29 = vld [vmem:[%s1945_s1 + $0x38] sm:$0xff] }
  0x16   : > { %s1217_s16 = sshll.u32 %s1959_s13, 2  ;;  %v1242_v30 = vld [vmem:[%s1948_s4 + $0x30] sm:$0xff]  ;;  %v1243_v31 = vld [vmem:[%s1948_s4 + $0x38] sm:$0xff]  ;;  %v289_v32 = vld [vmem:[%s1945_s1 + $0x40] sm:$0xff]  ;;  %s1902_s13 = scalar_lea.hbm %s1951_s7, %s1267_s22 }
  0x17   : > { %s277_s21 = scalar_lea.vmem %s1944_s0, %s1217_s16  ;;  %v1252_v33 = vld [vmem:[%s1948_s4 + $0x40] sm:$0xff]  ;;  %v1253_v34 = vld [vmem:[%s1948_s4 + $0x48] sm:$0xff]  ;;  %v1254_v36 = vld [vmem:[%s1948_s4 + $0x50] sm:$0xff]  ;;  %s1448_s16 = sshll.u32 %s1510_s28, 4  ;;  %s1449_s16 = int_to_ptr.vmem [resolvable:$false] %s1448_s16 }
  0x18   : > { %v280_v5 = vld [vmem:[%s277_s21] sm:$0xff]  ;;  %327 = vperm.xlu0 %1341, %v297_v9   ;;  %332 = vperm.xlu1 %1342, %v298_v10   ;;  %v290_v35 = vld [vmem:[%s1945_s1 + $0x48] sm:$0xff]  ;;  %v1255_v37 = vld [vmem:[%s1948_s4 + $0x58] sm:$0xff]  ;;  %s1215_s21 = sshll.u32 %s270_s20, 2  ;;  %s1450_s17 = scalar_lea.vmem %s1449_s16, 128 }
  0x19   : > { %v366_v7 = vcombine.high %v280_v5, %v280_v5  ;;  %v291_v38 = vld [vmem:[%s1945_s1 + $0x50] sm:$0xff]  ;;  %v1043_v39 = vld [vmem:[%s1950_s6] sm:$0x3]  ;;  %v292_v40 = vld [vmem:[%s1945_s1 + $0x58] sm:$0xff]  ;;  %s272_s23 = scalar_lea.vmem [#allocation2], %s1215_s21 }
  0x1a   : > { %s1152_s29 = sshll.u32 %s272_s23, 4  ;;  %s1904_s29 = int_to_ptr.vmem [resolvable:$true] %s1152_s29 }
  0x1b   : > { %1218 = vmatprep.subr.msk.mxu0 %vm404_vm0, %v366_v7  ;;  %s1444_s15 = scalar_lea.vmem %s1904_s29, 64  ;;  %p1451_p0 = scmp.lt.s32.totalorder %s1904_s29, %s1449_s16 }
  0x1c   : > { %1219 = vmatpush1.msk.msra.mxu0 %vm404_vm0, %v280_v5  ;;  %347 = vperm.xlu0 %1341, %v301_v12   ;;  %p1445_p11 = scmp.ne.s32.totalorder %s1904_s29, %s1444_s15  ;;  %p1452_p1 = scmp.lt.s32.totalorder %s1450_s17, %s1444_s15 }
  0x1d   : > { %1220 = vmatmul.mubr.msk.f32.vlgmr.msra.gmra.mrb[0].mxu0 %vm367_vm1, %v281_v8  ;;  %352 = vperm.xlu1 %1342, %v302_v13  }
  0x1e   : > { %479 = vmatprep.mubr.f32.mxu0 %v1508_v0  ;;  %p1446_p12 = pnand %p1445_p11, %p1589_p5  ;;  %p1453_p2 = por %p1452_p1, %p1451_p0 }
  0x20   : > { %588 = vperm.xlu0 %1341, %v582_v15   ;;  %p1447_p13 = pneg %p1446_p12 }
  0x21   : > { %1221 = vmatmul.mubr.msk.f32.gmra.mrb[2].mxu0 %vm367_vm1, %v282_v11  ;;  %593 = vperm.xlu1 %1342, %v583_v16  }
  0x22   : > { %485 = vmatprep.mubr.f32.mxu0 %v1508_v0  ;;  %p1454_p3 = pnand %p1453_p2, %p1447_p13 }
  0x24   : > { %337 = vperm.xlu0 %1341, %v299_v18   ;;  %v578_v18 = vld [vmem:[%s1947_s3] sm:$0xff] }
  0x25   : > { %1222 = vmatmul.mubr.msk.f32.gmra.mrb[4].mxu0 %vm367_vm1, %v283_v14  ;;  %342 = vperm.xlu1 %1342, %v300_v19  }
  0x26   : > { %491 = vmatprep.mubr.f32.mxu0 %v1508_v0 }
  0x28   : > { %357 = vperm.xlu0 %1341, %v303_v21   ;;  %v579_v21 = vld [vmem:[%s1947_s3 + $0x8] sm:$0xff] }
  0x29   : > { %1223 = vmatmul.mubr.msk.f32.gmra.mrb[6].mxu0 %vm367_vm1, %v284_v17  ;;  %362 = vperm.xlu1 %1342, %v304_v22  }
  0x2a   : > { %497 = vmatprep.mubr.f32.mxu0 %v1508_v0 }
  0x2c   : > { %598 = vperm.xlu0 %1341, %v584_v24   ;;  %v580_v24 = vld [vmem:[%s1947_s3 + $0x10] sm:$0xff] }
  0x2d   : > { %1224 = vmatmul.mubr.msk.f32.gmra.mrb[8].mxu0 %vm367_vm1, %v285_v20  ;;  %603 = vperm.xlu1 %1342, %v585_v25  }
  0x2e   : > { %503 = vmatprep.mubr.f32.mxu0 %v1508_v0 }
  0x30   : > { %744 = vperm.xlu0 %1341, %v1240_v27   ;;  %v581_v27 = vld [vmem:[%s1947_s3 + $0x18] sm:$0xff] }
  0x31   : > { %1225 = vmatmul.mubr.msk.f32.gmra.mrb[10].mxu0 %vm367_vm1, %v286_v23  ;;  %749 = vperm.xlu1 %1342, %v1241_v28  }
  0x32   : > { %509 = vmatprep.mubr.f32.mxu0 %v1508_v0 }
  0x34   : > { %754 = vperm.xlu0 %1341, %v1242_v30  }
  0x35   : > { %1226 = vmatmul.mubr.msk.f32.gmra.mrb[12].mxu0 %vm367_vm1, %v287_v26  ;;  %759 = vperm.xlu1 %1342, %v1243_v31  }
  0x36   : > { %515 = vmatprep.mubr.f32.mxu0 %v1508_v0 }
  0x38   : > { %899 = vperm.xlu0 %1341, %v1252_v33  }
  0x39   : > { %1227 = vmatmul.mubr.msk.f32.gmra.mrb[14].mxu0 %vm367_vm1, %v288_v29  ;;  %904 = vperm.xlu1 %1342, %v1253_v34  }
  0x3a   : > { %521 = vmatprep.mubr.f32.mxu0 %v1508_v0 }
  0x3c   : > { %909 = vperm.xlu0 %1341, %v1254_v36  }
  0x3d   : > { %1228 = vmatmul.mubr.msk.f32.gmra.mrb[16].mxu0 %vm367_vm1, %v289_v32  ;;  %914 = vperm.xlu1 %1342, %v1255_v37  }
  0x3e   : > { %527 = vmatprep.mubr.f32.mxu0 %v1508_v0 }
  0x40   : > { %1046 = vperm.xlu0 %1341, %v1043_v39  }
  0x41   : > { %1229 = vmatmul.mubr.msk.f32.gmra.mrb[18].mxu0 %vm367_vm1, %v290_v35 }
  0x42   : > { %533 = vmatprep.mubr.f32.mxu0 %v1508_v0 }
  0x45   : > { %1230 = vmatmul.mubr.msk.f32.gmra.mrb[20].mxu0 %vm367_vm1, %v291_v38 }
  0x46   : > { %539 = vmatprep.mubr.f32.mxu0 %v1508_v0 }
  0x49   : > { %1231 = vmatmul.mubr.msk.f32.gmra.mrb[22].mxu0 %vm367_vm1, %v292_v40 }
  0x4a   : > { %1116 = vmatprep.mubr.f32.mxu0 %v1508_v0 }
  0x8f   : > { %v308_v41 = vpop.permute.xlu0 %307  ;;  %v318_v50 = vpop.permute.xlu1 %317 }
  0x93   : > { %v313_v46 = vpop.permute.xlu0 %312  ;;  %v323_v56 = vpop.permute.xlu1 %322 }
  0x97   : > { %v328_v30 = vpop.permute.xlu0 %327  ;;  %v333_v32 = vpop.permute.xlu1 %332 }
  0x9b   : > { %v348_v31 = vpop.permute.xlu0 %347 }
  0x9c   : > { %v353_v34 = vpop.permute.xlu1 %352 }
  0x9f   : > { %v589_v33 = vpop.permute.xlu0 %588 }
  0xa0   : > { %v594_v39 = vpop.permute.xlu1 %593 }
  0xa3   : > { %v338_v38 = vpop.permute.xlu0 %337 }
  0xf0   : > { %v475_v42 = vpop.f32.mrb[0].mxu0 }
  0xf1   : > { %v476_v43 = vadd.f32 %v475_v42, %v308_v41  ;;  %v477_v44 = vpop.f32.mrb[1].mxu0 }
  0xf2   : > { %v478_v45 = vadd.f32 %v477_v44, %v308_v41 }
  0xf3   : > { %1344 = vtanh.f32 %v476_v43 }
  0xf4   : > { %v481_v47 = vpop.f32.mrb[2].mxu0  ;;  %1346 = vtanh.f32 %v478_v45 }
  0xf5   : > { %v482_v48 = vadd.f32 %v481_v47, %v313_v46  ;;  %v483_v49 = vpop.f32.mrb[3].mxu0 }
  0xf6   : > { %v484_v51 = vadd.f32 %v483_v49, %v313_v46  ;;  %v343_v46 = vpop.permute.xlu1 %342 }
  0xf7   : > { %1348 = vtanh.f32 %v482_v48  ;;  %v358_v48 = vpop.permute.xlu0 %357 }
  0xf8   : > { %1350 = vtanh.f32 %v484_v51  ;;  %v487_v52 = vpop.f32.mrb[4].mxu0 }
  0xf9   : > { %v488_v53 = vadd.f32 %v487_v52, %v318_v50  ;;  %v489_v54 = vpop.f32.mrb[5].mxu0 }
  0xfa   : > { %v490_v55 = vadd.f32 %v489_v54, %v318_v50 }
  0xfb   : > { %1352 = vtanh.f32 %v488_v53 }
  0xfc   : > { %v493_v57 = vpop.f32.mrb[6].mxu0  ;;  %1354 = vtanh.f32 %v490_v55 }
  0xfd   : > { %v494_v58 = vadd.f32 %v493_v57, %v323_v56  ;;  %v495_v59 = vpop.f32.mrb[7].mxu0  ;;  %v1345_v61 = vpop.eup %1344 }
  0xfe   : > { %v496_v60 = vadd.f32 %v495_v59, %v323_v56  ;;  %v1347_v62 = vpop.eup %1346  ;;  %v363_v57 = vpop.permute.xlu1 %362 }
  0xff   : > { %1356 = vtanh.f32 %v494_v58 }
 0x100   : > { %1358 = vtanh.f32 %v496_v60  ;;  %v499_v63 = vpop.f32.mrb[8].mxu0 }
 0x101   : > { %v1349_v1 = vpop.eup %1348  ;;  %v501_v2 = vpop.f32.mrb[9].mxu0  ;;  %v500_v35 = vadd.f32 %v499_v63, %v328_v30 }
 0x102   : > { %v1351_v3 = vpop.eup %1350  ;;  %v1270_v4 = vpack.c.bf16 %v1349_v1, %v1345_v61  ;;  %v502_v36 = vadd.f32 %v501_v2, %v328_v30 }
 0x103   : > { %v1268_v5 = vpack.c.bf16 %v1351_v3, %v1347_v62  ;;  %1360 = vtanh.f32 %v500_v35 }
 0x104   : > { %v505_v6 = vpop.f32.mrb[10].mxu0  ;;  %1362 = vtanh.f32 %v502_v36 }
 0x105   : > { %v507_v7 = vpop.f32.mrb[11].mxu0  ;;  %1269 = vmatprep.subr.bf16.mxu1 %v1268_v5  ;;  %v1353_v8 = vpop.eup %1352  ;;  %v506_v37 = vadd.f32 %v505_v6, %v333_v32 }
 0x106   : > { %1271 = vmatpush1.bf16.msra.mxu1 %v1270_v4  ;;  %v1355_v9 = vpop.eup %1354  ;;  %v508_v40 = vadd.f32 %v507_v7, %v333_v32  ;;  %v599_v5 = vpop.permute.xlu0 %598 }
 0x107   : > { %1364 = vtanh.f32 %v506_v37 }
 0x108   : > { %v511_v10 = vpop.f32.mrb[12].mxu0  ;;  %1366 = vtanh.f32 %v508_v40 }
 0x109   : > { %v1357_v11 = vpop.eup %1356  ;;  %v513_v12 = vpop.f32.mrb[13].mxu0  ;;  %v512_v41 = vadd.f32 %v511_v10, %v338_v38 }
 0x10a   : > { %v1359_v13 = vpop.eup %1358  ;;  %v1274_v14 = vpack.c.bf16 %v1357_v11, %v1353_v8  ;;  %v514_v42 = vadd.f32 %v513_v12, %v338_v38 }
 0x10b   : > { %v1272_v15 = vpack.c.bf16 %v1359_v13, %v1355_v9  ;;  %1368 = vtanh.f32 %v512_v41 }
 0x10c   : > { %v1740_v16 = vpop.f32.mrb[14].mxu0  ;;  %1370 = vtanh.f32 %v514_v42 }
 0x10d   : > { %v1742_v17 = vpop.f32.mrb[15].mxu0  ;;  %1273 = vmatprep.subr.bf16.mxu1 %v1272_v15  ;;  %v1764_v55 = vpop.eup %1360  ;;  %v518_v8 = vadd.f32 %v1740_v16, %v343_v46 }
 0x10e   : > { %1275 = vmatpush1.bf16.msra.mxu1 %v1274_v14  ;;  %v1766_v56 = vpop.eup %1362  ;;  %v520_v12 = vadd.f32 %v1742_v17, %v343_v46 }
 0x110   : > { %v523_v19 = vpop.f32.mrb[16].mxu0 }
 0x111   : > { %v525_v20 = vpop.f32.mrb[17].mxu0  ;;  %1232 = vmatmul.mubr.msk.f32.vlgmr.msra.gmra.mrb[0].mxu1 %vm606_vm2, %v578_v18  ;;  %v524_v43 = vadd.f32 %v523_v19, %v348_v31  ;;  %v1768_v59 = vpop.eup %1364 }
 0x112   : > { %689 = vmatprep.mubr.f32.mxu1 %v1508_v0  ;;  %v526_v44 = vadd.f32 %v525_v20, %v348_v31  ;;  %v1770_v63 = vpop.eup %1366  ;;  %v604_v18 = vpop.permute.xlu1 %603 }
 0x113   : > { %1372 = vtanh.f32 %v524_v43 }
 0x114   : > { %v529_v22 = vpop.f32.mrb[18].mxu0  ;;  %1374 = vtanh.f32 %v526_v44 }
 0x115   : > { %v531_v23 = vpop.f32.mrb[19].mxu0  ;;  %1233 = vmatmul.mubr.msk.f32.gmra.mrb[2].mxu1 %vm606_vm2, %v579_v21  ;;  %v530_v45 = vadd.f32 %v529_v22, %v353_v34  ;;  %v1772_v3 = vpop.eup %1368 }
 0x116   : > { %695 = vmatprep.mubr.f32.mxu1 %v1508_v0  ;;  %v532_v47 = vadd.f32 %v531_v23, %v353_v34  ;;  %v1774_v4 = vpop.eup %1370 }
 0x117   : > { %1376 = vtanh.f32 %v530_v45 }
 0x118   : > { %v535_v25 = vpop.f32.mrb[20].mxu0  ;;  %1378 = vtanh.f32 %v532_v47 }
 0x119   : > { %v537_v26 = vpop.f32.mrb[21].mxu0  ;;  %1234 = vmatmul.mubr.msk.f32.gmra.mrb[4].mxu1 %vm606_vm2, %v580_v24  ;;  %v536_v50 = vadd.f32 %v535_v25, %v358_v48 }
 0x11a   : > { %701 = vmatprep.mubr.f32.mxu1 %v1508_v0  ;;  %v538_v53 = vadd.f32 %v537_v26, %v358_v48 }
 0x11c   : > { %v541_v28 = vpop.f32.mrb[22].mxu0 }
 0x11d   : > { %v543_v29 = vpop.f32.mrb[23].mxu0  ;;  %1235 = vmatmul.mubr.msk.f32.gmra.mrb[6].mxu1 %vm606_vm2, %v581_v27  ;;  %v542_v60 = vadd.f32 %v541_v28, %v363_v57  ;;  %v1373_v7 = vpop.eup %1372 }
 0x11e   : > { %838 = vmatprep.mubr.f32.mxu1 %v1508_v0  ;;  %v544_v1 = vadd.f32 %v543_v29, %v363_v57  ;;  %v1375_v11 = vpop.eup %1374  ;;  %v1779_v16 = vsub.f32 %v1373_v7, %v1764_v55  ;;  %v1237_v7 = vld [vmem:[%s1947_s3 + $0x28] sm:$0xff] }
 0x11f   : > { %v1782_v17 = vsub.f32 %v1375_v11, %v1766_v56 }
 0x121   : > { %v1377_v14 = vpop.eup %1376 }
 0x122   : > { %v1379_v15 = vpop.eup %1378  ;;  %v1785_v27 = vsub.f32 %v1377_v14, %v1768_v59 }
 0x123   : > { %v1789_v30 = vsub.f32 %v1379_v15, %v1770_v63  ;;  %v750_v15 = vpop.permute.xlu1 %749 }
 0x1e4   : > { %v685_v49 = vpop.f32.mrb[0].mxu1 }
 0x1e5   : > { %v686_v51 = vadd.f32 %v685_v49, %v589_v33  ;;  %v687_v52 = vpop.f32.mrb[1].mxu1 }
 0x1e6   : > { %v688_v54 = vadd.f32 %v687_v52, %v589_v33 }
 0x1e7   : > { %1380 = vtanh.f32 %v686_v51 }
 0x1e8   : > { %1382 = vtanh.f32 %v688_v54  ;;  %v691_v58 = vpop.f32.mrb[2].mxu1 }
 0x1e9   : > { %1384 = vtanh.f32 %v536_v50  ;;  %v692_v61 = vadd.f32 %v691_v58, %v594_v39  ;;  %v693_v62 = vpop.f32.mrb[3].mxu1 }
 0x1ea   : > { %1386 = vtanh.f32 %v538_v53  ;;  %v694_v2 = vadd.f32 %v693_v62, %v594_v39 }
 0x1eb   : > { %1388 = vtanh.f32 %v692_v61 }
 0x1ec   : > { %1390 = vtanh.f32 %v694_v2  ;;  %v697_v6 = vpop.f32.mrb[4].mxu1 }
 0x1ed   : > { %1392 = vtanh.f32 %v542_v60  ;;  %v698_v9 = vadd.f32 %v697_v6, %v599_v5  ;;  %v699_v10 = vpop.f32.mrb[5].mxu1  ;;  %v1236_v6 = vld [vmem:[%s1947_s3 + $0x20] sm:$0xff] }
 0x1ee   : > { %1394 = vtanh.f32 %v544_v1  ;;  %v700_v13 = vadd.f32 %v699_v10, %v599_v5  ;;  %v745_v10 = vpop.permute.xlu0 %744 }
 0x1ef   : > { %1396 = vtanh.f32 %v698_v9  ;;  %v1239_v9 = vld [vmem:[%s1947_s3 + $0x38] sm:$0xff] }
 0x1f0   : > { %1398 = vtanh.f32 %v700_v13  ;;  %v703_v19 = vpop.f32.mrb[6].mxu1 }
 0x1f1   : > { %v1381_v20 = vpop.eup %1380  ;;  %1400 = vtanh.f32 %v518_v8  ;;  %v704_v21 = vadd.f32 %v703_v19, %v604_v18  ;;  %v705_v22 = vpop.f32.mrb[7].mxu1  ;;  %v1238_v8 = vld [vmem:[%s1947_s3 + $0x30] sm:$0xff] }
 0x1f2   : > { %v1383_v23 = vpop.eup %1382  ;;  %1402 = vtanh.f32 %v520_v12  ;;  %v706_v24 = vadd.f32 %v705_v22, %v604_v18  ;;  %v716_v28 = vmul.f32 %v1381_v20, %v1779_v16  ;;  %v755_v22 = vpop.permute.xlu0 %754 }
 0x1f3   : > { %v1385_v25 = vpop.eup %1384  ;;  %1404 = vtanh.f32 %v704_v21  ;;  %v717_v31 = vmul.f32 %v1383_v23, %v1782_v17 }
 0x1f4   : > { %v1387_v26 = vpop.eup %1386  ;;  %1406 = vtanh.f32 %v706_v24  ;;  %v724_v37 = vadd.f32 %v1764_v55, %v716_v28  ;;  %v1799_v43 = vsub.f32 %v1385_v25, %v1772_v3  ;;  %v760_v28 = vpop.permute.xlu1 %759 }
 0x1f5   : > { %v1389_v29 = vpop.eup %1388  ;;  %v725_v40 = vadd.f32 %v1766_v56, %v717_v31  ;;  %v1804_v46 = vsub.f32 %v1387_v26, %v1774_v4 }
 0x1f6   : > { %v1391_v32 = vpop.eup %1390  ;;  %v718_v33 = vmul.f32 %v1389_v29, %v1785_v27 }
 0x1f7   : > { %v1393_v34 = vpop.eup %1392  ;;  %v719_v35 = vmul.f32 %v1391_v32, %v1789_v30 }
 0x1f8   : > { %v1395_v36 = vpop.eup %1394  ;;  %v726_v38 = vadd.f32 %v1768_v59, %v718_v33 }
 0x1f9   : > { %v1397_v39 = vpop.eup %1396  ;;  %v727_v41 = vadd.f32 %v1770_v63, %v719_v35 }
 0x1fa   : > { %v1399_v42 = vpop.eup %1398  ;;  %v1278_v44 = vpack.c.bf16 %v726_v38, %v724_v37  ;;  %v720_v50 = vmul.f32 %v1397_v39, %v1799_v43 }
 0x1fb   : > { %v1801_v45 = vpop.eup %1400  ;;  %v1276_v47 = vpack.c.bf16 %v727_v41, %v725_v40  ;;  %v721_v53 = vmul.f32 %v1399_v42, %v1804_v46 }
 0x1fc   : > { %v1806_v48 = vpop.eup %1402  ;;  %v1809_v49 = vsub.f32 %v1393_v34, %v1801_v45  ;;  %v728_v60 = vadd.f32 %v1772_v3, %v720_v50 }
 0x1fd   : > { %v1405_v51 = vpop.eup %1404  ;;  %v1813_v52 = vsub.f32 %v1395_v36, %v1806_v48  ;;  %1277 = vmatprep.subr.bf16.mxu1 %v1276_v47  ;;  %v729_v62 = vadd.f32 %v1774_v4, %v721_v53 }
 0x1fe   : > { %v1407_v54 = vpop.eup %1406  ;;  %1279 = vmatpush1.bf16.msra.mxu1 %v1278_v44  ;;  %v722_v57 = vmul.f32 %v1405_v51, %v1809_v49 }
 0x1ff   : > { %v723_v58 = vmul.f32 %v1407_v54, %v1813_v52 }
 0x200   : > { %v730_v61 = vadd.f32 %v1801_v45, %v722_v57 }
 0x201   : > { %v731_v1 = vadd.f32 %v1806_v48, %v723_v58 }
 0x202   : > { %v1282_v2 = vpack.c.bf16 %v730_v61, %v728_v60 }
 0x203   : > { %v1280_v5 = vpack.c.bf16 %v731_v1, %v729_v62 }
 0x205   : > { %1281 = vmatprep.subr.bf16.mxu1 %v1280_v5 }
 0x206   : > { %1283 = vmatpush1.bf16.msra.mxu1 %v1282_v2 }
 0x209   : > { %1244 = vmatmul.mubr.msk.f32.vlgmr.msra.gmra.mrb[8].mxu1 %vm606_vm2, %v1236_v6 }
 0x20a   : > { %844 = vmatprep.mubr.f32.mxu1 %v1508_v0 }
 0x20d   : > { %1245 = vmatmul.mubr.msk.f32.gmra.mrb[10].mxu1 %vm606_vm2, %v1237_v7 }
 0x20e   : > { %850 = vmatprep.mubr.f32.mxu1 %v1508_v0 }
 0x211   : > { %1246 = vmatmul.mubr.msk.f32.gmra.mrb[12].mxu1 %vm606_vm2, %v1238_v8 }
 0x212   : > { %856 = vmatprep.mubr.f32.mxu1 %v1508_v0 }
 0x215   : > { %1247 = vmatmul.mubr.msk.f32.gmra.mrb[14].mxu1 %vm606_vm2, %v1239_v9 }
 0x216   : > { %993 = vmatprep.mubr.f32.mxu1 %v1508_v0 }
 0x2dc   : > { %v840_v11 = vpop.f32.mrb[8].mxu1 }
 0x2dd   : > { %v841_v12 = vadd.f32 %v840_v11, %v745_v10  ;;  %v842_v13 = vpop.f32.mrb[9].mxu1  ;;  %v1248_v11 = vld [vmem:[%s1947_s3 + $0x40] sm:$0xff] }
 0x2de   : > { %v843_v14 = vadd.f32 %v842_v13, %v745_v10  ;;  %v1250_v13 = vld [vmem:[%s1947_s3 + $0x50] sm:$0xff] }
 0x2df   : > { %1408 = vtanh.f32 %v841_v12  ;;  %v1249_v12 = vld [vmem:[%s1947_s3 + $0x48] sm:$0xff] }
 0x2e0   : > { %1410 = vtanh.f32 %v843_v14  ;;  %v846_v18 = vpop.f32.mrb[10].mxu1  ;;  %v1251_v14 = vld [vmem:[%s1947_s3 + $0x58] sm:$0xff] }
 0x2e1   : > { %v847_v19 = vadd.f32 %v846_v18, %v750_v15  ;;  %v848_v20 = vpop.f32.mrb[11].mxu1 }
 0x2e2   : > { %v849_v21 = vadd.f32 %v848_v20, %v750_v15  ;;  %v900_v15 = vpop.permute.xlu0 %899 }
 0x2e3   : > { %1412 = vtanh.f32 %v847_v19 }
 0x2e4   : > { %1414 = vtanh.f32 %v849_v21  ;;  %v852_v23 = vpop.f32.mrb[12].mxu1 }
 0x2e5   : > { %v853_v24 = vadd.f32 %v852_v23, %v755_v22  ;;  %v854_v25 = vpop.f32.mrb[13].mxu1 }
 0x2e6   : > { %v855_v26 = vadd.f32 %v854_v25, %v755_v22  ;;  %v905_v22 = vpop.permute.xlu1 %904 }
 0x2e7   : > { %1416 = vtanh.f32 %v853_v24 }
 0x2e8   : > { %1418 = vtanh.f32 %v855_v26  ;;  %v858_v29 = vpop.f32.mrb[14].mxu1 }
 0x2e9   : > { %v1409_v31 = vpop.eup %1408  ;;  %v859_v32 = vadd.f32 %v858_v29, %v760_v28  ;;  %v860_v33 = vpop.f32.mrb[15].mxu1 }
 0x2ea   : > { %v1411_v34 = vpop.eup %1410  ;;  %v861_v35 = vadd.f32 %v860_v33, %v760_v28  ;;  %v871_v36 = vmul.f32 %v1409_v31, %v1779_v16  ;;  %v915_v33 = vpop.permute.xlu1 %914 }
 0x2eb   : > { %1420 = vtanh.f32 %v859_v32  ;;  %v872_v38 = vmul.f32 %v1411_v34, %v1782_v17 }
 0x2ec   : > { %1422 = vtanh.f32 %v861_v35  ;;  %v879_v42 = vadd.f32 %v1764_v55, %v871_v36 }
 0x2ed   : > { %v1413_v37 = vpop.eup %1412  ;;  %v880_v50 = vadd.f32 %v1766_v56, %v872_v38 }
 0x2ee   : > { %v1415_v39 = vpop.eup %1414  ;;  %v873_v40 = vmul.f32 %v1413_v37, %v1785_v27 }
 0x2ef   : > { %v874_v41 = vmul.f32 %v1415_v39, %v1789_v30 }
 0x2f0   : > { %v881_v44 = vadd.f32 %v1768_v59, %v873_v40 }
 0x2f1   : > { %v1417_v47 = vpop.eup %1416  ;;  %v882_v51 = vadd.f32 %v1770_v63, %v874_v41 }
 0x2f2   : > { %v1419_v53 = vpop.eup %1418  ;;  %v1286_v54 = vpack.c.bf16 %v881_v44, %v879_v42  ;;  %v875_v58 = vmul.f32 %v1417_v47, %v1799_v43 }
 0x2f3   : > { %v1284_v57 = vpack.c.bf16 %v882_v51, %v880_v50  ;;  %v876_v61 = vmul.f32 %v1419_v53, %v1804_v46 }
 0x2f4   : > { %v883_v5 = vadd.f32 %v1772_v3, %v875_v58 }
 0x2f5   : > { %v1421_v60 = vpop.eup %1420  ;;  %1285 = vmatprep.subr.bf16.mxu1 %v1284_v57  ;;  %v884_v7 = vadd.f32 %v1774_v4, %v876_v61 }
 0x2f6   : > { %v1423_v62 = vpop.eup %1422  ;;  %1287 = vmatpush1.bf16.msra.mxu1 %v1286_v54  ;;  %v877_v1 = vmul.f32 %v1421_v60, %v1809_v49 }
 0x2f7   : > { %v878_v2 = vmul.f32 %v1423_v62, %v1813_v52 }
 0x2f8   : > { %v885_v6 = vadd.f32 %v1801_v45, %v877_v1 }
 0x2f9   : > { %v886_v8 = vadd.f32 %v1806_v48, %v878_v2 }
 0x2fa   : > { %v1290_v9 = vpack.c.bf16 %v885_v6, %v883_v5 }
 0x2fb   : > { %v1288_v10 = vpack.c.bf16 %v886_v8, %v884_v7 }
 0x2fd   : > { %1289 = vmatprep.subr.bf16.mxu1 %v1288_v10 }
 0x2fe   : > { %1291 = vmatpush1.bf16.msra.mxu1 %v1290_v9 }
 0x301   : > { %1256 = vmatmul.mubr.msk.f32.vlgmr.msra.gmra.mrb[16].mxu1 %vm606_vm2, %v1248_v11 }
 0x302   : > { %999 = vmatprep.mubr.f32.mxu1 %v1508_v0 }
 0x305   : > { %1257 = vmatmul.mubr.msk.f32.gmra.mrb[18].mxu1 %vm606_vm2, %v1249_v12 }
 0x306   : > { %1005 = vmatprep.mubr.f32.mxu1 %v1508_v0 }
 0x309   : > { %1258 = vmatmul.mubr.msk.f32.gmra.mrb[20].mxu1 %vm606_vm2, %v1250_v13 }
 0x30a   : > { %1011 = vmatprep.mubr.f32.mxu1 %v1508_v0  ;;  %v910_v0 = vpop.permute.xlu0 %909 }
 0x30d   : > { %1259 = vmatmul.mubr.msk.f32.gmra.mrb[22].mxu1 %vm606_vm2, %v1251_v14 }
 0x3d4   : > { %v995_v18 = vpop.f32.mrb[16].mxu1 }
 0x3d5   : > { %v996_v19 = vadd.f32 %v995_v18, %v900_v15  ;;  %v997_v20 = vpop.f32.mrb[17].mxu1 }
 0x3d6   : > { %v998_v21 = vadd.f32 %v997_v20, %v900_v15 }
 0x3d7   : > { %1424 = vtanh.f32 %v996_v19 }
 0x3d8   : > { %1426 = vtanh.f32 %v998_v21  ;;  %v1001_v23 = vpop.f32.mrb[18].mxu1 }
 0x3d9   : > { %v1002_v24 = vadd.f32 %v1001_v23, %v905_v22  ;;  %v1003_v25 = vpop.f32.mrb[19].mxu1 }
 0x3da   : > { %v1004_v26 = vadd.f32 %v1003_v25, %v905_v22 }
 0x3db   : > { %1428 = vtanh.f32 %v1002_v24 }
 0x3dc   : > { %1430 = vtanh.f32 %v1004_v26  ;;  %v1007_v28 = vpop.f32.mrb[20].mxu1 }
 0x3dd   : > { %v1008_v29 = vadd.f32 %v1007_v28, %v910_v0  ;;  %v1009_v31 = vpop.f32.mrb[21].mxu1 }
 0x3de   : > { %v1010_v32 = vadd.f32 %v1009_v31, %v910_v0 }
 0x3df   : > { %1432 = vtanh.f32 %v1008_v29 }
 0x3e0   : > { %1434 = vtanh.f32 %v1010_v32  ;;  %v1013_v34 = vpop.f32.mrb[22].mxu1 }
 0x3e1   : > { %v1425_v35 = vpop.eup %1424  ;;  %v1014_v36 = vadd.f32 %v1013_v34, %v915_v33  ;;  %v1015_v37 = vpop.f32.mrb[23].mxu1 }
 0x3e2   : > { %v1427_v38 = vpop.eup %1426  ;;  %v1016_v39 = vadd.f32 %v1015_v37, %v915_v33  ;;  %v1026_v40 = vmul.f32 %v1425_v35, %v1779_v16 }
 0x3e3   : > { %1436 = vtanh.f32 %v1014_v36  ;;  %v1027_v42 = vmul.f32 %v1427_v38, %v1782_v17 }
 0x3e4   : > { %1438 = vtanh.f32 %v1016_v39  ;;  %v1034_v51 = vadd.f32 %v1764_v55, %v1026_v40 }
 0x3e5   : > { %v1429_v41 = vpop.eup %1428  ;;  %v1035_v57 = vadd.f32 %v1766_v56, %v1027_v42 }
 0x3e6   : > { %v1431_v44 = vpop.eup %1430  ;;  %v1028_v47 = vmul.f32 %v1429_v41, %v1785_v27 }
 0x3e7   : > { %v1029_v50 = vmul.f32 %v1431_v44, %v1789_v30 }
 0x3e8   : > { %v1036_v53 = vadd.f32 %v1768_v59, %v1028_v47 }
 0x3e9   : > { %v1433_v54 = vpop.eup %1432  ;;  %v1037_v58 = vadd.f32 %v1770_v63, %v1029_v50 }
 0x3ea   : > { %v1435_v60 = vpop.eup %1434  ;;  %v1294_v61 = vpack.c.bf16 %v1036_v53, %v1034_v51  ;;  %v1030_v62 = vmul.f32 %v1433_v54, %v1799_v43 }
 0x3eb   : > { %v1292_v16 = vpack.c.bf16 %v1037_v58, %v1035_v57  ;;  %v1031_v27 = vmul.f32 %v1435_v60, %v1804_v46  ;;  %v1042_v46 = vld [vmem:[%s1949_s5] sm:$0x3] }
 0x3ec   : > { %v1038_v30 = vadd.f32 %v1772_v3, %v1030_v62 }
 0x3ed   : > { %v1437_v17 = vpop.eup %1436  ;;  %1293 = vmatprep.subr.bf16.mxu0 %v1292_v16  ;;  %v1039_v63 = vadd.f32 %v1774_v4, %v1031_v27 }
 0x3ee   : > { %v1439_v1 = vpop.eup %1438  ;;  %1295 = vmatpush1.bf16.msra.mxu0 %v1294_v61  ;;  %v1032_v55 = vmul.f32 %v1437_v17, %v1809_v49  ;;  %v1047_v49 = vpop.permute.xlu0 %1046 }
 0x3ef   : > { %v1033_v59 = vmul.f32 %v1439_v1, %v1813_v52 }
 0x3f0   : > { %v1040_v56 = vadd.f32 %v1801_v45, %v1032_v55 }
 0x3f1   : > { %v1041_v2 = vadd.f32 %v1806_v48, %v1033_v59 }
 0x3f2   : > { %v1298_v43 = vpack.c.bf16 %v1040_v56, %v1038_v30 }
 0x3f3   : > { %v1296_v5 = vpack.c.bf16 %v1041_v2, %v1039_v63 }
 0x3f5   : > { %1297 = vmatprep.subr.bf16.mxu0 %v1296_v5 }
 0x3f6   : > { %1299 = vmatpush1.bf16.msra.mxu0 %v1298_v43 }
 0x3f9   : > { %1260 = vmatmul.mubr.msk.f32.vlgmr.msra.gmra.mrb[24].mxu0 %vm606_vm2, %v1042_v46 }
 0x4cc   : > { %v1118_v3 = vpop.f32.mrb[24].mxu0 }
 0x4cd   : > { %v1119_v52 = vadd.f32 %v1118_v3, %v1047_v49  ;;  %v1120_v6 = vpop.f32.mrb[25].mxu0 }
 0x4ce   : > { %v1121_v45 = vadd.f32 %v1120_v6, %v1047_v49 }
 0x4cf   : > { %1440 = vtanh.f32 %v1119_v52 }
 0x4d0   : > { %1442 = vtanh.f32 %v1121_v45 }
 0x4d9   : > { %v1441_v4 = vpop.eup %1440 }
 0x4da   : > { %v1443_v48 = vpop.eup %1442 }
 0x4db   : > { %v1127_v7 = vcombine.low %v1441_v4, %v1443_v48 }
 0x4dd   : > { %1261 = vst.sshfl [vmem:[%s272_s23] sm:$0x33 pattern:$0x76325410] %v1127_v7 }
 0x4de   : > { %1457 = shalt.err (!%p1454_p3)
}
 0x4df   : > { %s1458_s18 = scalar_lea.hbm %s1902_s13, 64  ;;  %s1462_s21 = scalar_lea.hbm %s1951_s7, 128 }
 0x4e0   : > { %p1459_p4 = scmp.ne.s32.totalorder %s1902_s13, %s1458_s18  ;;  %p1463_p9 = scmp.lt.u32.totalorder %s1902_s13, %s1951_s7 }
 0x4e1   : > { %p1464_p10 = scmp.lt.u32.totalorder %s1462_s21, %s1458_s18  ;;  %p1466_p12 = scmp.lt.u32.totalorder %s1458_s18, %s1902_s13 }
 0x4e2   : > { %p1460_p7 = pnand %p1459_p4, %p1589_p5 }
 0x4e3   : > { %p1465_p11 = por %p1464_p10, %p1463_p9 }
 0x4e4   : > { %p1461_p8 = pneg %p1460_p7 }
 0x4e5   : > { %p1467_p13 = por %p1466_p12, %p1465_p11 }
 0x4e7   : > { %p1468_p0 = pnand %p1467_p13, %p1461_p8 }
 0x4e9   : > { %1471 = shalt.err (!%p1468_p0)
}
 0x4ea   : > { %1300 = dma.vmem_to_hbm [thread:$0]  (%p1589_p5), %s1904_s29, 64, %s1902_s13, %s1138_s14  }
 0x4eb PF: > { %p1306_p1 = scmp.ge.s32.totalorder %s1506_s27, 2  ;;  %s1164_s8 = sand.u32 1, %s1494_s24  }
 0x4ec   : > { %s1165_s9 = scalar_lea.sflag [#allocation3], %s1164_s8 }
 0x4ed   : > { %p1303_p2 = pnand %p1306_p1, %p1593_p6 }
 0x4ef   : > { %1489 = dma.done.wait (!%p1303_p2), %s1165_s9, 64  }
 0x4f0   : > { %1491 = vsyncadd (!%p1303_p2), %s1165_s9, 4294967232  ;;  %p17_p3 = scmp.ge.s32.totalorder %s1576_s30, 4   ;;  %s1954_s24 = smov %s1498_s25 }
 0x4f1   : > { %s1955_s25 = smov %s1502_s26  ;;  %s1956_s26 = smov %s1587_s10 }
 0x4f2   : > { %s1957_s27 = smov %s1576_s30  ;;  %19 = sbr.rel (!%p17_p3) target bundleno = 3 (0x3), region = 87 }
 0x4f9   :  { %1170 = vsyncpa [#allocation3], 1 }
 0x4fa   :  { %1172 = vsyncpa [#allocation3 + $0x1], 1 }

</bundles_post_ra>
